<compile_context>
chip_gen: v7x
topology: tpu7x:2x2x1
jax: 0.10.0
libtpu: 0.0.40
codegen_flags: <defaults>
</compile_context>

<pallas_src>
import functools
import math

import jax
import jax.numpy as jnp
from jax.experimental import pallas as pl
from jax.experimental.pallas import tpu as pltpu


# ---------------------------------------------------------------------------
# small helpers
# ---------------------------------------------------------------------------
def _pick_tile_m(m, target=256):
    """Largest divisor of m that is <= target and a multiple of 8 (else m)."""
    if m <= target:
        return m
    for t in range(target, 7, -1):
        if m % t == 0 and t % 8 == 0:
            return t
    return m


def _pick_tile_c(c, target=256):
    """256-wide output tiles when possible (v6e/v7x MXU), else 128, else full."""
    for t in (target, 128):
        if c >= t and c % t == 0:
            return t
    return c


def _vmem_limit(block_bytes):
    """Scoped-VMEM request derived from the actual block working set."""
    need = 3 * block_bytes + (4 << 20)            # double buffering + slack
    return int(min(max(need, 16 << 20), 64 << 20))


# ---------------------------------------------------------------------------
# Kernel 1a: 1x1 conv as matmul + per-M-tile BN partial statistics
#   grid = (C tiles, M tiles); both axes "parallel" (stats are per tile).
# ---------------------------------------------------------------------------
def _mm_stats_kernel(x_ref, w_ref, y_ref, ps_ref):
    y = jnp.dot(x_ref[...], w_ref[...], preferred_element_type=jnp.float32)
    y_ref[...] = y
    s = jnp.sum(y, axis=0, keepdims=True)
    sq = jnp.sum(y * y, axis=0, keepdims=True)
    ps_ref[...] = jnp.concatenate([s, sq], axis=0)


def matmul_stats(x_bf16, w_bf16):
    m, k = x_bf16.shape
    k2, c = w_bf16.shape
    assert k == k2, (k, k2)
    tm = _pick_tile_m(m)
    tc = _pick_tile_c(c)
    nm, nc = m // tm, c // tc
    blk = tm * k * 2 + k * tc * 2 + tm * tc * 4 + 2 * tc * 4
    y, ps = pl.pallas_call(
        _mm_stats_kernel,
        grid=(nc, nm),
        in_specs=[
            pl.BlockSpec((tm, k), lambda cc, mm: (mm, 0)),
            pl.BlockSpec((k, tc), lambda cc, mm: (0, cc)),
        ],
        out_specs=[
            pl.BlockSpec((tm, tc), lambda cc, mm: (mm, cc)),
            pl.BlockSpec((None, 2, tc), lambda cc, mm: (mm, 0, cc)),
        ],
        out_shape=[
            jax.ShapeDtypeStruct((m, c), jnp.float32),
            jax.ShapeDtypeStruct((nm, 2, c), jnp.float32),
        ],
        compiler_params=pltpu.CompilerParams(
            dimension_semantics=("parallel", "parallel"),
            vmem_limit_bytes=_vmem_limit(blk)),
    )(x_bf16, w_bf16)
    return y, jnp.sum(ps, axis=0)            # y [m,c] f32 ; stats [2,c] f32


# ---------------------------------------------------------------------------
# Kernel 1b: 3x3 conv (pad=1, stride s) as in-kernel implicit GEMM + stats
#   One grid step = one image x one output-channel tile; 9 shifted unit-stride
#   views of the padded input are matmul-accumulated in f32.
# ---------------------------------------------------------------------------
def _conv3x3_stats_kernel(xp_ref, w_ref, y_ref, ps_ref, *, taps, ho, wo):
    # xp_ref: [P, Hp, Wp, Cin] bf16 (one image, all tap planes)
    # w_ref : [9, Cin, tc] bf16 ;  y_ref: [ho*wo, tc] f32 ;  ps_ref: [2, tc] f32
    cin = xp_ref.shape[-1]
    cout = w_ref.shape[-1]
    acc = jnp.zeros((ho * wo, cout), jnp.float32)
    for t, (p, ro, co) in enumerate(taps):        # static python loop, 9 iters
        xt = xp_ref[p, pl.ds(ro, ho), pl.ds(co, wo), :]        # [ho, wo, cin]
        acc = acc + jnp.dot(xt.reshape(ho * wo, cin), w_ref[t],
                            preferred_element_type=jnp.float32)
    y_ref[...] = acc
    s = jnp.sum(acc, axis=0, keepdims=True)
    sq = jnp.sum(acc * acc, axis=0, keepdims=True)
    ps_ref[...] = jnp.concatenate([s, sq], axis=0)


def _build_tap_planes(h_nhwc, stride):
    """Spatial pad=1 plus a parity (space-to-batch) split so every 3x3 tap is a
    unit-stride slice of one plane.  Total volume ~= input (no 9x im2col)."""
    n, h, w, c = h_nhwc.shape
    s = stride
    ho = (h - 1) // s + 1
    wo = (w - 1) // s + 1
    xp = jnp.pad(h_nhwc, ((0, 0), (1, 1), (1, 1), (0, 0)))
    off = 2 // s                                   # largest intra-plane offset
    hp, wp = ho + off, wo + off
    subs = []
    for a in range(s):
        for b in range(s):
            sub = xp[:, a::s, b::s, :][:, :hp, :wp, :]
            dh, dw = hp - sub.shape[1], wp - sub.shape[2]
            if dh or dw:
                sub = jnp.pad(sub, ((0, 0), (0, dh), (0, dw), (0, 0)))
            subs.append(sub)
    planes = jnp.stack(subs, axis=1)               # [n, s*s, hp, wp, c]
    taps = [((dy % s) * s + (dx % s), dy // s, dx // s)
            for dy in range(3) for dx in range(3)]
    return planes, taps, ho, wo


def conv3x3_stats(h_nhwc_bf16, w2_taps_bf16, stride):
    n, h, w, cin = h_nhwc_bf16.shape
    cout = w2_taps_bf16.shape[-1]
    planes, taps, ho, wo = _build_tap_planes(h_nhwc_bf16, stride)
    p, hp, wp = planes.shape[1], planes.shape[2], planes.shape[3]
    tc = _pick_tile_c(cout)
    nc = cout // tc
    blk = p * hp * wp * cin * 2 + 9 * cin * tc * 2 + 2 * ho * wo * tc * 4
    kern = functools.partial(_conv3x3_stats_kernel, taps=taps, ho=ho, wo=wo)
    y, ps = pl.pallas_call(
        kern,
        grid=(nc, n),
        in_specs=[
            pl.BlockSpec((None, p, hp, wp, cin), lambda cc, nn: (nn, 0, 0, 0, 0)),
            pl.BlockSpec((9, cin, tc), lambda cc, nn: (0, 0, cc)),
        ],
        out_specs=[
            pl.BlockSpec((None, ho * wo, tc), lambda cc, nn: (nn, 0, cc)),
            pl.BlockSpec((None, 2, tc), lambda cc, nn: (nn, 0, cc)),
        ],
        out_shape=[
            jax.ShapeDtypeStruct((n, ho * wo, cout), jnp.float32),
            jax.ShapeDtypeStruct((n, 2, cout), jnp.float32),
        ],
        compiler_params=pltpu.CompilerParams(
            dimension_semantics=("parallel", "parallel"),
            vmem_limit_bytes=_vmem_limit(blk)),
    )(planes, w2_taps_bf16)
    return y.reshape(n * ho * wo, cout), jnp.sum(ps, axis=0), ho, wo


# ---------------------------------------------------------------------------
# Kernel 2: BN normalize folded into one FMA (+ optional residual, + ReLU)
#   scale = gamma * rsqrt(var + eps) ;  shift = beta - mean * scale
# ---------------------------------------------------------------------------
def _bn_apply_kernel(*refs, relu, res_mode, inv_m, eps):
    if res_mode == "bn":
        y_ref, p_ref, r_ref, rp_ref, o_ref = refs
    elif res_mode == "raw":
        y_ref, p_ref, r_ref, o_ref = refs
        rp_ref = None
    else:
        y_ref, p_ref, o_ref = refs
        r_ref = rp_ref = None

    def scale_shift(pref):
        mean = pref[0:1, :] * inv_m
        var = pref[1:2, :] * inv_m - mean * mean          # E[y^2] - mean^2
        inv_std = jax.lax.rsqrt(var + eps)                # EUP
        scale = pref[2:3, :] * inv_std
        shift = pref[3:4, :] - mean * scale
        return scale, shift

    sc, sh = scale_shift(p_ref)
    out = y_ref[...] * sc + sh
    if res_mode == "bn":
        rsc, rsh = scale_shift(rp_ref)
        out = out + (r_ref[...] * rsc + rsh)
    elif res_mode == "raw":
        out = out + r_ref[...].astype(jnp.float32)
    if relu:
        out = jnp.maximum(out, 0.0)
    o_ref[...] = out.astype(o_ref.dtype)


def bn_apply(y, stats, gamma, beta, *, relu, out_dtype, eps=1e-5,
             residual=None, res_stats=None, res_gamma=None, res_beta=None):
    m, c = y.shape
    tm = _pick_tile_m(m)
    nm = m // tm
    pk = jnp.concatenate([stats,
                          gamma.reshape(1, c).astype(jnp.float32),
                          beta.reshape(1, c).astype(jnp.float32)], axis=0)
    if residual is None:
        res_mode = "none"
    elif res_stats is None:
        res_mode = "raw"
    else:
        res_mode = "bn"

    in_specs = [pl.BlockSpec((tm, c), lambda mm: (mm, 0)),
                pl.BlockSpec((4, c), lambda mm: (0, 0))]
    args = [y, pk]
    blk = 2 * tm * c * 4 + 4 * c * 4
    if res_mode != "none":
        in_specs.append(pl.BlockSpec((tm, c), lambda mm: (mm, 0)))
        args.append(residual)
        blk += tm * c * residual.dtype.itemsize
    if res_mode == "bn":
        rpk = jnp.concatenate([res_stats,
                               res_gamma.reshape(1, c).astype(jnp.float32),
                               res_beta.reshape(1, c).astype(jnp.float32)],
                              axis=0)
        in_specs.append(pl.BlockSpec((4, c), lambda mm: (0, 0)))
        args.append(rpk)

    kern = functools.partial(_bn_apply_kernel, relu=relu, res_mode=res_mode,
                             inv_m=1.0 / float(m), eps=eps)
    return pl.pallas_call(
        kern,
        grid=(nm,),
        in_specs=in_specs,
        out_specs=pl.BlockSpec((tm, c), lambda mm: (mm, 0)),
        out_shape=jax.ShapeDtypeStruct((m, c), out_dtype),
        compiler_params=pltpu.CompilerParams(
            dimension_semantics=("parallel",),
            vmem_limit_bytes=_vmem_limit(blk)),
    )(*args)


# ---------------------------------------------------------------------------
# Bottleneck forward
# ---------------------------------------------------------------------------
def bottleneck_forward(x_nchw, params, *, stride=1, eps=1e-5):
    """relu(bn3(conv3(relu(bn2(conv2(relu(bn1(conv1(x)))))))) + shortcut(x))."""
    N, Cin, H, W = x_nchw.shape
    planes = params["w1"].shape[0]
    Cexp = params["w3"].shape[0]

    x_nhwc = jnp.transpose(x_nchw.astype(jnp.float32), (0, 2, 3, 1))
    x2d = x_nhwc.reshape(N * H * W, Cin)

    # ---- conv1 (1x1) + bn1 + relu ----
    w1 = params["w1"].reshape(planes, Cin).T                    # [Cin, planes]
    y1, st1 = matmul_stats(x2d.astype(jnp.bfloat16), w1.astype(jnp.bfloat16))
    h1 = bn_apply(y1, st1, params["g1"], params["b1"], relu=True,
                  out_dtype=jnp.bfloat16, eps=eps)              # [M1, planes]

    # ---- conv2 (3x3, stride, pad=1) + bn2 + relu ----
    w2 = jnp.transpose(params["w2"], (2, 3, 1, 0)).reshape(9, planes, planes)
    y2, st2, Ho, Wo = conv3x3_stats(h1.reshape(N, H, W, planes),
                                    w2.astype(jnp.bfloat16), stride)
    h2 = bn_apply(y2, st2, params["g2"], params["b2"], relu=True,
                  out_dtype=jnp.bfloat16, eps=eps)              # [M2, planes]
    M2 = N * Ho * Wo

    # ---- conv3 (1x1) + bn3, shortcut, residual add, relu ----
    w3 = params["w3"].reshape(Cexp, planes).T                   # [planes, Cexp]
    y3, st3 = matmul_stats(h2, w3.astype(jnp.bfloat16))

    if "ws" in params:
        xs = x_nhwc[:, ::stride, ::stride, :].reshape(M2, Cin)
        ws = params["ws"].reshape(Cexp, Cin).T                  # [Cin, Cexp]
        ys, sts = matmul_stats(xs.astype(jnp.bfloat16), ws.astype(jnp.bfloat16))
        out2d = bn_apply(y3, st3, params["g3"], params["b3"], relu=True,
                         out_dtype=jnp.float32, eps=eps,
                         residual=ys, res_stats=sts,
                         res_gamma=params["gs"], res_beta=params["bs"])
    else:
        # identity shortcut (stride == 1 and Cin == expansion*planes)
        out2d = bn_apply(y3, st3, params["g3"], params["b3"], relu=True,
                         out_dtype=jnp.float32, eps=eps, residual=x2d)

    out = out2d.reshape(N, Ho, Wo, Cexp)
    return jnp.transpose(out, (0, 3, 1, 2))                     # NCHW


# ---------------------------------------------------------------------------
# Parameter init (mirrors the torch module's parameter shapes)
# ---------------------------------------------------------------------------
def init_params(key, in_planes, planes, stride=1, expansion=4):
    cexp = expansion * planes
    ks = jax.random.split(key, 12)

    def conv_w(k, out_c, in_c, ksz):
        bound = 1.0 / math.sqrt(in_c * ksz * ksz)
        return jax.random.uniform(k, (out_c, in_c, ksz, ksz), jnp.float32,
                                  -bound, bound)

    def bn(k1, k2, c):
        g = 1.0 + 0.1 * jax.random.normal(k1, (c,), jnp.float32)
        b = 0.1 * jax.random.normal(k2, (c,), jnp.float32)
        return g, b

    p = {}
    p["w1"] = conv_w(ks[0], planes, in_planes, 1)
    p["g1"], p["b1"] = bn(ks[1], ks[2], planes)
    p["w2"] = conv_w(ks[3], planes, planes, 3)
    p["g2"], p["b2"] = bn(ks[4], ks[5], planes)
    p["w3"] = conv_w(ks[6], cexp, planes, 1)
    p["g3"], p["b3"] = bn(ks[7], ks[8], cexp)
    if stride != 1 or in_planes != cexp:
        p["ws"] = conv_w(ks[9], cexp, in_planes, 1)
        p["gs"], p["bs"] = bn(ks[10], ks[11], cexp)
    return p


# ---------------------------------------------------------------------------
# Pure-JAX reference replicating the PyTorch forward (training-mode BN).
# cast_bf16=True rounds the conv operands / inter-layer activations at the
# same points the kernel does, isolating the intentional bf16-MXU difference.
# ---------------------------------------------------------------------------
def _reference(x, params, *, stride=1, eps=1e-5, cast_bf16=False):
    def cast(a):
        return a.astype(jnp.bfloat16).astype(jnp.float32) if cast_bf16 else a

    def conv(h, w, s, pad):
        return jax.lax.conv_general_dilated(
            cast(h), cast(w), window_strides=(s, s),
            padding=[(pad, pad), (pad, pad)],
            dimension_numbers=("NCHW", "OIHW", "NCHW"),
            precision=jax.lax.Precision.HIGHEST)

    def bn_train(y, g, b):
        mean = jnp.mean(y, axis=(0, 2, 3), keepdims=True)
        var = jnp.var(y, axis=(0, 2, 3), keepdims=True)   # biased, as F.batch_norm
        yhat = (y - mean) / jnp.sqrt(var + eps)
        return yhat * g.reshape(1, -1, 1, 1) + b.reshape(1, -1, 1, 1)

    out = jax.nn.relu(bn_train(conv(x, params["w1"], 1, 0),
                               params["g1"], params["b1"]))
    out = jax.nn.relu(bn_train(conv(out, params["w2"], stride, 1),
                               params["g2"], params["b2"]))
    out = bn_train(conv(out, params["w3"], 1, 0), params["g3"], params["b3"])
    if "ws" in params:
        sc = bn_train(conv(x, params["ws"], stride, 0),
                      params["gs"], params["bs"])
    else:
        sc = x
    return jax.nn.relu(out + sc)


if __name__ == "__main__":
    key = jax.random.PRNGKey(0)

    configs = [
        # (batch, in_planes, planes, H, W, stride)
        (2, 32, 16, 16, 16, 1),   # projection shortcut (channel mismatch)
        (2, 32, 16, 16, 16, 2),   # projection shortcut, stride 2
        (2, 64, 16, 16, 16, 1),   # identity shortcut (in_planes == 4*planes)
    ]
    for idx, (n, cin, planes, h, w, stride) in enumerate(configs):
        kx, kp, key = jax.random.split(key, 3)
        x = jax.random.normal(kx, (n, cin, h, w), jnp.float32)
        params = init_params(kp, cin, planes, stride=stride)

        out = jax.block_until_ready(bottleneck_forward(x, params, stride=stride))

        cexp = 4 * planes
        ho = (h - 1) // stride + 1
        wo = (w - 1) // stride + 1
        assert out.shape == (n, cexp, ho, wo), (out.shape, (n, cexp, ho, wo))

        # bf16-matched reference (same rounding points as the kernel) -> tight
        ref_m = _reference(x, params, stride=stride, cast_bf16=True)
        err_m = float(jnp.max(jnp.abs(out - ref_m)))
        assert err_m < 5e-3, f"config {idx}: matched-ref max abs err {err_m}"

        # full-f32 reference -> loose (intentional bf16-MXU difference)
        ref_f = _reference(x, params, stride=stride, cast_bf16=False)
        err_f = float(jnp.max(jnp.abs(out - ref_f)))
        assert err_f < 1e-1, f"config {idx}: f32-ref max abs err {err_f}"

    print("KERNEL_OK")
</pallas_src>

<mosaic_0001>
module attributes {stable_mosaic.version = 11 : i64} {
  func.func @_mm_stats_kernel(%arg0: i32, %arg1: i32, %arg2: memref<256x32xbf16, #tpu.memory_space<vmem>>, %arg3: memref<32x16xbf16, #tpu.memory_space<vmem>>, %arg4: memref<256x16xf32, #tpu.memory_space<vmem>>, %arg5: memref<1x2x16xf32, #tpu.memory_space<vmem>>) attributes {dimension_semantics = [#tpu.dimension_semantics<parallel>, #tpu.dimension_semantics<parallel>], iteration_bounds = array<i64: 1, 2>, scalar_prefetch = 0 : i64, scratch_operands = 0 : i64, tpu.core_type = #tpu.core_type<tc>, window_params = [{transform_indices = @transform_0, window_bounds = array<i64: 256, 32>}, {transform_indices = @transform_1, window_bounds = array<i64: 32, 16>}, {transform_indices = @transform_2, window_bounds = array<i64: 256, 16>}, {transform_indices = @transform_3, window_bounds = array<i64: 1, 2, 16>}]} {
    %c0 = arith.constant 0 : index
    %c0_0 = arith.constant 0 : index
    %0 = vector.load %arg2[%c0, %c0_0] : memref<256x32xbf16, #tpu.memory_space<vmem>>, vector<256x32xbf16>
    %c0_1 = arith.constant 0 : index
    %c0_2 = arith.constant 0 : index
    %1 = vector.load %arg3[%c0_1, %c0_2] : memref<32x16xbf16, #tpu.memory_space<vmem>>, vector<32x16xbf16>
    %cst = arith.constant dense<0.000000e+00> : vector<256x16xf32>
    %2 = tpu.matmul %0, %1, %cst {dimension_numbers = #tpu.dot_dimension_numbers<[1], [0], [0], [1], [0, 0, 1, 1], [], []>} : vector<256x32xbf16>, vector<32x16xbf16>, vector<256x16xf32> -> vector<256x16xf32>
    %c0_3 = arith.constant 0 : index
    %c0_4 = arith.constant 0 : index
    %3 = vector.load %arg4[%c0_3, %c0_4] : memref<256x16xf32, #tpu.memory_space<vmem>>, vector<256x16xf32>
    tpu.vector_store %arg4[%c0_3, %c0_4], %2 {strides = array<i32>} : memref<256x16xf32, #tpu.memory_space<vmem>>, vector<256x16xf32>,
    %cst_5 = arith.constant dense<0.000000e+00> : vector<16xf32>
    %4 = vector.multi_reduction <add>, %2, %cst_5 [0] : vector<256x16xf32> to vector<16xf32>
    %5 = vector.shape_cast %4 : vector<16xf32> to vector<1x16xf32>
    %6 = arith.mulf %2, %2 : vector<256x16xf32>
    %cst_6 = arith.constant dense<0.000000e+00> : vector<16xf32>
    %7 = vector.multi_reduction <add>, %6, %cst_6 [0] : vector<256x16xf32> to vector<16xf32>
    %8 = vector.shape_cast %7 : vector<16xf32> to vector<1x16xf32>
    %9 = tpu.concatenate %5, %8 in 0 : vector<1x16xf32>, vector<1x16xf32> -> vector<2x16xf32>
    %c0_7 = arith.constant 0 : index
    %c0_8 = arith.constant 0 : index
    %c0_9 = arith.constant 0 : index
    %10 = vector.load %arg5[%c0_7, %c0_8, %c0_9] : memref<1x2x16xf32, #tpu.memory_space<vmem>>, vector<1x2x16xf32>
    %11 = vector.shape_cast %10 : vector<1x2x16xf32> to vector<2x16xf32>
    %12 = vector.shape_cast %9 : vector<2x16xf32> to vector<1x2x16xf32>
    tpu.vector_store %arg5[%c0_7, %c0_8, %c0_9], %12 {strides = array<i32>} : memref<1x2x16xf32, #tpu.memory_space<vmem>>, vector<1x2x16xf32>,
    return
  }
  func.func @transform_0(%arg0: i32, %arg1: i32) -> (i32, i32) {
    %c0_i32 = arith.constant 0 : i32
    %c0_i32_0 = arith.constant 0 : i32
    return %arg1, %c0_i32 : i32, i32
  }
  func.func @transform_1(%arg0: i32, %arg1: i32) -> (i32, i32) {
    %c0_i32 = arith.constant 0 : i32
    %c0_i32_0 = arith.constant 0 : i32
    return %c0_i32, %arg0 : i32, i32
  }
  func.func @transform_2(%arg0: i32, %arg1: i32) -> (i32, i32) {
    %c0_i32 = arith.constant 0 : i32
    return %arg1, %arg0 : i32, i32
  }
  func.func @transform_3(%arg0: i32, %arg1: i32) -> (i32, i32, i32) {
    %c0_i32 = arith.constant 0 : i32
    %c0_i32_0 = arith.constant 0 : i32
    return %arg1, %c0_i32, %arg0 : i32, i32, i32
  }
}

</mosaic_0001>

<bundles_post_ra>
// kernel: tpu_custom_call.1
= control target key start
LH: loop header
LB: loop body
LE: loop exit
PB: predicated region body
PF: predicated region fallthrough
CT: control target
= control target key end

     0   :  { %9 = vsyncpa [#allocation3], 0  ;;  %s1578_s0 = inlined_call_operand.vmem [shape: bf16[512,32], index: 0, kind: input, shape index: {}]   ;;  %s1579_s1 = inlined_call_operand.vmem [shape: bf16[32,16], index: 1, kind: input, shape index: {}]   ;;  %s1580_s2 = inlined_call_operand.vmem [shape: f32[512,16], index: 2, kind: output, shape index: {0}]   ;;  %s1581_s3 = inlined_call_operand.hbm [shape: f32[2,2,16], index: 3, kind: output, shape index: {1}]  }
   0x1   :  { %11 = vsyncpa [#allocation3 + $0x1], 0  ;;  %s1193_s12 = smov 0   ;;  %s1195_s13 = smov 0  }
   0x2   :  { %s1197_s14 = smov 0   ;;  %s1199_s15 = smov 0  }
   0x3   :  { %s1201_s16 = smov 0   ;;  %s1203_s17 = smov 0  }
   0x4 LB: > { %s912_s18 = sadd.s32 4294967295, %s1170_s17   ;;  %s913_s19 = sadd.s32 4294967294, %s1170_s17   ;;  %s1170_s17 = sphi %s1203_s17, %s17_s17   ;;  %s1166_s16 = sphi %s1201_s16, %s1588_s16   ;;  %s1162_s15 = sphi %s1199_s15, %s1587_s15   ;;  %s1158_s14 = sphi %s1197_s14, %s1586_s14   ;;  %s1154_s13 = sphi %s1195_s13, %s1585_s13   ;;  %s1150_s12 = sphi %s1193_s12, %s1584_s12  }
   0x5   : > { %s26_s20 = sadd.s32 1, %s1166_s16  ;;  %s118_s21 = sadd.s32 1, %s1158_s14 }
   0x6   : > { %p27_p0 = scmp.ge.s32.totalorder %s26_s20, 2  ;;  %p128_p1 = scmp.ne.s32.totalorder %s1158_s14, %s1154_s13 }
   0x7   : > { %p129_p2 = scmp.eq.s32.totalorder %s912_s18, 1  ;;  %p134_p3 = scmp.ne.s32.totalorder %s1154_s13, %s1150_s12 }
   0x8   : > { %s1590_s20 = smov (%p27_p0, %s26_s20), 0  ;;  %p135_p5 = scmp.eq.s32.totalorder %s913_s19, 1 }
   0x9   : > { %p1231_p4 = por %p129_p2, %p128_p1  ;;  %s113_s23 = ssub.s32 %s1166_s16, %s1590_s20 }
   0xa   : > { %p917_p6 = scmp.ge.s32.totalorder %s1170_s17, 1  ;;  %p116_p7 = scmp.eq.s32.totalorder %s113_s23, 0 }
   0xb   : > { %p1238_p8 = por %p135_p5, %p134_p3  ;;  %p169_p9 = scmp.lt.s32.totalorder %s1170_s17, 3 }
   0xc   : > { %s1244_s25 = scalar_select %p116_p7, %s1158_s14, %s118_s21  }
   0xd   : > { %p170_p10 = pnand %p917_p6, %p169_p9 }
   0xe   : > { %v1074_v0 = vld [vmem:[%s1579_s1] sm:$0xff] (!%p170_p10)   ;;  %s1249_s28 = sshll.u32 (!%p170_p10), %s1162_s15, 5  ;;  %v1075_v1 = vld [vmem:[%s1579_s1 + $0x8] sm:$0xff] (!%p170_p10)   ;;  %vm353_vm0 = vcmask (!%p170_p10), 261120   ;;  %vm563_vm1 = vcmask (!%p170_p10), 130048   ;;  %s202_s18 = sand.u32 (!%p170_p10), 1, %s1154_s13  }
   0xf   : > { %173 = sbr.rel (%p170_p10) target bundleno = 335 (0x14f), region = 28  ;;  %p206_p11 = scmp.lt.s32.totalorder (!%p170_p10), %s1249_s28, 63  ;;  %979 = vmatprep.subr.bf16.mxu0 (!%p170_p10), %v1074_v0  ;;  %1015 = vmatprep.subr.bf16.mxu1 (!%p170_p10), %v1074_v0  ;;  %vm766_vm2 = vcmask (!%p170_p10), 1040384   ;;  %vm768_vm3 = vcmask (!%p170_p10), 123904  }
  0x10   : > { %980 = vmatpush3.bf16.msra.mxu0 (!%p170_p10), %v1074_v0  ;;  %1017 = vmatpush3.bf16.msra.mxu1 (!%p170_p10), %v1074_v0  ;;  %s918_s19 = sshll.u32 (!%p170_p10), %s202_s18, 1  ;;  %s1531_s29 = scalar_lea.hbm (!%p170_p10), %s1581_s3, %s1249_s28 }
  0x11   : > { %981 = vmatprep.subr.bf16.mxu0 (!%p170_p10), %v1075_v1  ;;  %1016 = vmatprep.subr.bf16.mxu1 (!%p170_p10), %v1075_v1  ;;  %s204_s21 = scalar_lea.vmem (!%p170_p10), [#allocation2], %s918_s19  ;;  %s779_s30 = scalar_lea.sflag (!%p170_p10), [#allocation3], %s202_s18 }
  0x12   : > { %s797_s23 = sshll.u32 (!%p170_p10), %s204_s21, 4  ;;  %s1533_s23 = int_to_ptr.vmem [resolvable:$true] %s797_s23 }
  0x14   : > { %982 = vmatpush3.bf16.msra.mxu0 (!%p170_p10), %v1075_v1  ;;  %1018 = vmatpush3.bf16.msra.mxu1 (!%p170_p10), %v1075_v1 }
  0x16   : > { %s1256_s4 = scalar_select %p206_p11, %s1249_s28, 63 }
  0x18   : > { %s920_s5 = sshll.u32 %s1256_s4, 2  ;;  %s922_s9 = sshll.u32 %s1256_s4, 3 }
  0x19   : > { %s1262_s8 = scalar_lea.vmem %s1578_s0, %s920_s5  ;;  %s1300_s15 = scalar_lea.vmem %s1580_s2, %s922_s9 }
  0x1a   : > { %v1076_v2 = vld [vmem:[%s1262_s8] sm:$0xff]   ;;  %v1077_v3 = vld [vmem:[%s1262_s8 + $0x8] sm:$0xff]   ;;  %v1078_v4 = vld [vmem:[%s1262_s8 + $0x10] sm:$0xff]   ;;  %s1092_s4 = scalar_lea.vmem %s1533_s23, 32  ;;  %s1172_s5 = smov [#allocation2]  }
  0x1b   : > { %983 = vmatprep.mubr.msk.bf16.mxu0 %vm353_vm0, %v1076_v2  ;;  %v1079_v5 = vld [vmem:[%s1262_s8 + $0x18] sm:$0xff]   ;;  %v1080_v6 = vld [vmem:[%s1262_s8 + $0x20] sm:$0xff]   ;;  %v1085_v8 = vld [vmem:[%s1262_s8 + $0x48] sm:$0xff]   ;;  %p1093_p12 = scmp.ne.s32.totalorder %s1533_s23, %s1092_s4  ;;  %s1096_s6 = sshll.u32 %s1172_s5, 4  ;;  %s1097_s6 = int_to_ptr.vmem [resolvable:$false] %s1096_s6 }
  0x1c   : > { %984 = vmatmul.mubr.msk.bf16.vlgmr.msra.gmra.mrb[0].mxu0 %vm353_vm0, %v1077_v3  ;;  %v1084_v7 = vld [vmem:[%s1262_s8 + $0x40] sm:$0xff]   ;;  %v1086_v9 = vld [vmem:[%s1262_s8 + $0x50] sm:$0xff]   ;;  %v1081_v10 = vld [vmem:[%s1262_s8 + $0x28] sm:$0xff]   ;;  %s1098_s7 = scalar_lea.vmem %s1097_s6, 64  ;;  %p1099_p1 = scmp.lt.s32.totalorder %s1533_s23, %s1097_s6 }
  0x1d   : > { %987 = vmatprep.mubr.msk.bf16.mxu0 %vm353_vm0, %v1078_v4  ;;  %999 = vmatprep.mubr.msk.bf16.mxu1 %vm353_vm0, %v1084_v7  ;;  %v1087_v11 = vld [vmem:[%s1262_s8 + $0x58] sm:$0xff]   ;;  %v1082_v12 = vld [vmem:[%s1262_s8 + $0x30] sm:$0xff]   ;;  %v1088_v13 = vld [vmem:[%s1262_s8 + $0x60] sm:$0xff]   ;;  %p1094_p13 = pnand %p1093_p12, %p1231_p4  ;;  %p1100_p2 = scmp.lt.s32.totalorder %s1098_s7, %s1092_s4 }
  0x1e   : > { %1000 = vmatmul.mubr.msk.bf16.vlgmr.msra.gmra.mrb[0].mxu1 %vm353_vm0, %v1085_v8  ;;  %v1083_v14 = vld [vmem:[%s1262_s8 + $0x38] sm:$0xff]   ;;  %v1089_v15 = vld [vmem:[%s1262_s8 + $0x68] sm:$0xff]   ;;  %v1090_v16 = vld [vmem:[%s1262_s8 + $0x70] sm:$0xff]  }
  0x1f   : > { %1003 = vmatprep.mubr.msk.bf16.mxu1 %vm353_vm0, %v1086_v9  ;;  %v1091_v17 = vld [vmem:[%s1262_s8 + $0x78] sm:$0xff]   ;;  %p1095_p0 = pneg %p1094_p13  ;;  %p1101_p3 = por %p1100_p2, %p1099_p1 }
  0x21   : > { %p1102_p5 = pnand %p1101_p3, %p1095_p0 }
  0x24   : > { %988 = vmatmul.mubr.msk.bf16.gmra.mrb[4].mxu0 %vm353_vm0, %v1079_v5 }
  0x25   : > { %991 = vmatprep.mubr.msk.bf16.mxu0 %vm353_vm0, %v1080_v6 }
  0x26   : > { %1004 = vmatmul.mubr.msk.bf16.gmra.mrb[4].mxu1 %vm353_vm0, %v1087_v11 }
  0x27   : > { %1007 = vmatprep.mubr.msk.bf16.mxu1 %vm353_vm0, %v1088_v13 }
  0x2c   : > { %992 = vmatmul.mubr.msk.bf16.gmra.mrb[8].mxu0 %vm353_vm0, %v1081_v10 }
  0x2d   : > { %995 = vmatprep.mubr.msk.bf16.mxu0 %vm353_vm0, %v1082_v12 }
  0x2e   : > { %1008 = vmatmul.mubr.msk.bf16.gmra.mrb[8].mxu1 %vm353_vm0, %v1089_v15 }
  0x2f   : > { %1011 = vmatprep.mubr.msk.bf16.mxu1 %vm353_vm0, %v1090_v16 }
  0x34   : > { %996 = vmatmul.mubr.msk.bf16.gmra.mrb[12].mxu0 %vm353_vm0, %v1083_v14 }
  0x36   : > { %1012 = vmatmul.mubr.msk.bf16.gmra.mrb[12].mxu1 %vm353_vm0, %v1091_v17 }
  0xef   : > { %v985_v18 = vpop.f32.mrb[0].mxu0 }
  0xf0   : > { %566 = vst.msk [vmem:[%s1300_s15 + $0x10] sm:$0xff] %vm563_vm1, %v985_v18  ;;  %v436_v19 = vpop.f32.mrb[1].mxu0  ;;  %v667_v23 = vmul.f32 %v985_v18, %v985_v18  ;;  %v599_v28 = vsel %vm563_vm1, %v985_v18, 0.0 }
  0xf1   : > { %564 = vst.msk [vmem:[%s1300_s15] sm:$0xff] %vm563_vm1, %v436_v19  ;;  %v665_v20 = vmul.f32 %v436_v19, %v436_v19  ;;  %v986_v21 = vpop.f32.mrb[2].mxu0  ;;  %v596_v24 = vsel %vm563_vm1, %v436_v19, 0.0  ;;  %v1317_v37 = vpop.f32.mrb[0].mxu1 }
  0xf2   : > { %567 = vst.msk [vmem:[%s1300_s15 + $0x18] sm:$0xff] %vm563_vm1, %v986_v21  ;;  %v439_v22 = vpop.f32.mrb[3].mxu0  ;;  %v668_v30 = vmul.f32 %v986_v21, %v986_v21  ;;  %v700_v34 = vsel %vm563_vm1, %v667_v23, 0.0  ;;  %v601_v35 = vsel %vm563_vm1, %v986_v21, 0.0  ;;  %582 = vst.msk [vmem:[%s1300_s15 + $0x90] sm:$0xff] %vm563_vm1, %v1317_v37  ;;  %v1324_v41 = vpop.f32.mrb[1].mxu1 }
  0xf3   : > { %565 = vst.msk [vmem:[%s1300_s15 + $0x8] sm:$0xff] %vm563_vm1, %v439_v22  ;;  %v597_v25 = vsel %vm563_vm1, %v439_v22, 0.0  ;;  %v666_v26 = vmul.f32 %v439_v22, %v439_v22  ;;  %v697_v29 = vsel %vm563_vm1, %v665_v20, 0.0  ;;  %580 = vst.msk [vmem:[%s1300_s15 + $0x80] sm:$0xff] %vm563_vm1, %v1324_v41  ;;  %v1333_v46 = vpop.f32.mrb[2].mxu1 }
  0xf4   : > { %v598_v27 = vadd.f32 %v597_v25, %v596_v24  ;;  %v702_v42 = vsel %vm563_vm1, %v668_v30, 0.0  ;;  %583 = vst.msk [vmem:[%s1300_s15 + $0x98] sm:$0xff] %vm563_vm1, %v1333_v46  ;;  %v1340_v50 = vpop.f32.mrb[3].mxu1 }
  0xf5   : > { %v698_v31 = vsel %vm563_vm1, %v666_v26, 0.0  ;;  %581 = vst.msk [vmem:[%s1300_s15 + $0x88] sm:$0xff] %vm563_vm1, %v1340_v50 }
  0xf6   : > { %v600_v32 = vadd.f32 %v599_v28, %v598_v27  ;;  %v699_v33 = vadd.f32 %v698_v31, %v697_v29 }
  0xf7   : > { %v989_v36 = vpop.f32.mrb[4].mxu0 }
  0xf8   : > { %v701_v38 = vadd.f32 %v700_v34, %v699_v33  ;;  %570 = vst.msk [vmem:[%s1300_s15 + $0x30] sm:$0xff] %vm563_vm1, %v989_v36  ;;  %v452_v39 = vpop.f32.mrb[5].mxu0  ;;  %v602_v40 = vadd.f32 %v601_v35, %v600_v32  ;;  %v671_v51 = vmul.f32 %v989_v36, %v989_v36  ;;  %v607_v57 = vsel %vm563_vm1, %v989_v36, 0.0 }
  0xf9   : > { %568 = vst.msk [vmem:[%s1300_s15 + $0x20] sm:$0xff] %vm563_vm1, %v452_v39  ;;  %v603_v43 = vsel %vm563_vm1, %v452_v39, 0.0  ;;  %v669_v44 = vmul.f32 %v452_v39, %v452_v39  ;;  %v990_v45 = vpop.f32.mrb[6].mxu0  ;;  %v1353_v1 = vpop.f32.mrb[4].mxu1 }
  0xfa   : > { %v604_v47 = vadd.f32 %v603_v43, %v602_v40  ;;  %v703_v48 = vadd.f32 %v702_v42, %v701_v38  ;;  %571 = vst.msk [vmem:[%s1300_s15 + $0x38] sm:$0xff] %vm563_vm1, %v990_v45  ;;  %v455_v49 = vpop.f32.mrb[7].mxu0  ;;  %v672_v58 = vmul.f32 %v990_v45, %v990_v45  ;;  %v708_v62 = vsel %vm563_vm1, %v671_v51, 0.0  ;;  %586 = vst.msk [vmem:[%s1300_s15 + $0xb0] sm:$0xff] %vm563_vm1, %v1353_v1  ;;  %v1360_v5 = vpop.f32.mrb[5].mxu1 }
  0xfb   : > { %v704_v52 = vsel %vm563_vm1, %v669_v44, 0.0  ;;  %569 = vst.msk [vmem:[%s1300_s15 + $0x28] sm:$0xff] %vm563_vm1, %v455_v49  ;;  %v605_v53 = vsel %vm563_vm1, %v455_v49, 0.0  ;;  %v670_v54 = vmul.f32 %v455_v49, %v455_v49  ;;  %v609_v63 = vsel %vm563_vm1, %v990_v45, 0.0  ;;  %584 = vst.msk [vmem:[%s1300_s15 + $0xa0] sm:$0xff] %vm563_vm1, %v1360_v5  ;;  %v1369_v10 = vpop.f32.mrb[6].mxu1 }
  0xfc   : > { %v705_v55 = vadd.f32 %v704_v52, %v703_v48  ;;  %v606_v56 = vadd.f32 %v605_v53, %v604_v47  ;;  %v710_v6 = vsel %vm563_vm1, %v672_v58, 0.0  ;;  %587 = vst.msk [vmem:[%s1300_s15 + $0xb8] sm:$0xff] %vm563_vm1, %v1369_v10  ;;  %v1376_v14 = vpop.f32.mrb[7].mxu1 }
  0xfd   : > { %v706_v59 = vsel %vm563_vm1, %v670_v54, 0.0  ;;  %585 = vst.msk [vmem:[%s1300_s15 + $0xa8] sm:$0xff] %vm563_vm1, %v1376_v14 }
  0xfe   : > { %v608_v60 = vadd.f32 %v607_v57, %v606_v56  ;;  %v707_v61 = vadd.f32 %v706_v59, %v705_v55  ;;  %v681_v56 = vmul.f32 %v1324_v41, %v1324_v41 }
  0xff   : > { %v993_v0 = vpop.f32.mrb[8].mxu0 }
 0x100   : > { %v709_v2 = vadd.f32 %v708_v62, %v707_v61  ;;  %574 = vst.msk [vmem:[%s1300_s15 + $0x50] sm:$0xff] %vm563_vm1, %v993_v0  ;;  %v468_v3 = vpop.f32.mrb[9].mxu0  ;;  %v610_v4 = vadd.f32 %v609_v63, %v608_v60  ;;  %v675_v15 = vmul.f32 %v993_v0, %v993_v0  ;;  %v615_v21 = vsel %vm563_vm1, %v993_v0, 0.0 }
 0x101   : > { %572 = vst.msk [vmem:[%s1300_s15 + $0x40] sm:$0xff] %vm563_vm1, %v468_v3  ;;  %v611_v7 = vsel %vm563_vm1, %v468_v3, 0.0  ;;  %v673_v8 = vmul.f32 %v468_v3, %v468_v3  ;;  %v994_v9 = vpop.f32.mrb[10].mxu0  ;;  %v1389_v29 = vpop.f32.mrb[8].mxu1  ;;  %v627_v61 = vsel %vm563_vm1, %v1324_v41, 0.0 }
 0x102   : > { %v612_v11 = vadd.f32 %v611_v7, %v610_v4  ;;  %v711_v12 = vadd.f32 %v710_v6, %v709_v2  ;;  %575 = vst.msk [vmem:[%s1300_s15 + $0x58] sm:$0xff] %vm563_vm1, %v994_v9  ;;  %v471_v13 = vpop.f32.mrb[11].mxu0  ;;  %v676_v22 = vmul.f32 %v994_v9, %v994_v9  ;;  %v716_v26 = vsel %vm563_vm1, %v675_v15, 0.0  ;;  %590 = vst.msk [vmem:[%s1300_s15 + $0xd0] sm:$0xff] %vm563_vm1, %v1389_v29  ;;  %v1396_v33 = vpop.f32.mrb[9].mxu1 }
 0x103   : > { %v712_v16 = vsel %vm563_vm1, %v673_v8, 0.0  ;;  %573 = vst.msk [vmem:[%s1300_s15 + $0x48] sm:$0xff] %vm563_vm1, %v471_v13  ;;  %v613_v17 = vsel %vm563_vm1, %v471_v13, 0.0  ;;  %v674_v18 = vmul.f32 %v471_v13, %v471_v13  ;;  %v617_v27 = vsel %vm563_vm1, %v994_v9, 0.0  ;;  %588 = vst.msk [vmem:[%s1300_s15 + $0xc0] sm:$0xff] %vm563_vm1, %v1396_v33  ;;  %v1405_v39 = vpop.f32.mrb[10].mxu1 }
 0x104   : > { %v713_v19 = vadd.f32 %v712_v16, %v711_v12  ;;  %v614_v20 = vadd.f32 %v613_v17, %v612_v11  ;;  %v718_v34 = vsel %vm563_vm1, %v676_v22, 0.0  ;;  %591 = vst.msk [vmem:[%s1300_s15 + $0xd8] sm:$0xff] %vm563_vm1, %v1405_v39  ;;  %v1412_v44 = vpop.f32.mrb[11].mxu1  ;;  %v728_v4 = vsel %vm563_vm1, %v681_v56, 0.0 }
 0x105   : > { %v714_v23 = vsel %vm563_vm1, %v674_v18, 0.0  ;;  %589 = vst.msk [vmem:[%s1300_s15 + $0xc8] sm:$0xff] %vm563_vm1, %v1412_v44  ;;  %v682_v6 = vmul.f32 %v1340_v50, %v1340_v50  ;;  %v683_v12 = vmul.f32 %v1317_v37, %v1317_v37  ;;  %v629_v13 = vsel %vm563_vm1, %v1340_v50, 0.0 }
 0x106   : > { %v616_v24 = vadd.f32 %v615_v21, %v614_v20  ;;  %v715_v25 = vadd.f32 %v714_v23, %v713_v19  ;;  %v631_v16 = vsel %vm563_vm1, %v1317_v37, 0.0  ;;  %v684_v19 = vmul.f32 %v1333_v46, %v1333_v46 }
 0x107   : > { %v997_v28 = vpop.f32.mrb[12].mxu0  ;;  %v730_v20 = vsel %vm563_vm1, %v682_v6, 0.0  ;;  %v685_v21 = vmul.f32 %v1360_v5, %v1360_v5  ;;  %v633_v37 = vsel %vm563_vm1, %v1333_v46, 0.0  ;;  %v637_v46 = vsel %vm563_vm1, %v1376_v14, 0.0 }
 0x108   : > { %v717_v30 = vadd.f32 %v716_v26, %v715_v25  ;;  %578 = vst.msk [vmem:[%s1300_s15 + $0x70] sm:$0xff] %vm563_vm1, %v997_v28  ;;  %v484_v31 = vpop.f32.mrb[13].mxu0  ;;  %v618_v32 = vadd.f32 %v617_v27, %v616_v24  ;;  %v679_v45 = vmul.f32 %v997_v28, %v997_v28  ;;  %v623_v53 = vsel %vm563_vm1, %v997_v28, 0.0 }
 0x109   : > { %576 = vst.msk [vmem:[%s1300_s15 + $0x60] sm:$0xff] %vm563_vm1, %v484_v31  ;;  %v619_v35 = vsel %vm563_vm1, %v484_v31, 0.0  ;;  %v677_v36 = vmul.f32 %v484_v31, %v484_v31  ;;  %v998_v38 = vpop.f32.mrb[14].mxu0  ;;  %v1429_v62 = vpop.f32.mrb[12].mxu1  ;;  %v732_v24 = vsel %vm563_vm1, %v683_v12, 0.0  ;;  %v635_v25 = vsel %vm563_vm1, %v1360_v5, 0.0 }
 0x10a   : > { %v620_v40 = vadd.f32 %v619_v35, %v618_v32  ;;  %v719_v42 = vadd.f32 %v718_v34, %v717_v30  ;;  %579 = vst.msk [vmem:[%s1300_s15 + $0x78] sm:$0xff] %vm563_vm1, %v998_v38  ;;  %v487_v43 = vpop.f32.mrb[15].mxu0  ;;  %v680_v54 = vmul.f32 %v998_v38, %v998_v38  ;;  %v724_v59 = vsel %vm563_vm1, %v679_v45, 0.0  ;;  %594 = vst.msk [vmem:[%s1300_s15 + $0xf0] sm:$0xff] %vm563_vm1, %v1429_v62  ;;  %v1434_v2 = vpop.f32.mrb[13].mxu1 }
 0x10b   : > { %v720_v47 = vsel %vm563_vm1, %v677_v36, 0.0  ;;  %577 = vst.msk [vmem:[%s1300_s15 + $0x68] sm:$0xff] %vm563_vm1, %v487_v43  ;;  %v621_v48 = vsel %vm563_vm1, %v487_v43, 0.0  ;;  %v678_v49 = vmul.f32 %v487_v43, %v487_v43  ;;  %v625_v60 = vsel %vm563_vm1, %v998_v38, 0.0  ;;  %592 = vst.msk [vmem:[%s1300_s15 + $0xe0] sm:$0xff] %vm563_vm1, %v1434_v2  ;;  %v1014_v41 = vpop.f32.mrb[14].mxu1 }
 0x10c   : > { %v721_v51 = vadd.f32 %v720_v47, %v719_v42  ;;  %v622_v52 = vadd.f32 %v621_v48, %v620_v40  ;;  %v726_v3 = vsel %vm563_vm1, %v680_v54, 0.0  ;;  %595 = vst.msk [vmem:[%s1300_s15 + $0xf8] sm:$0xff] %vm563_vm1, %v1014_v41  ;;  %v1446_v9 = vsel %vm563_vm1, %v1014_v41, 0.0  ;;  %v1448_v11 = vpop.f32.mrb[15].mxu1 }
 0x10d   : > { %v722_v55 = vsel %vm563_vm1, %v678_v49, 0.0  ;;  %v696_v15 = vmul.f32 %v1014_v41, %v1014_v41  ;;  %593 = vst.msk [vmem:[%s1300_s15 + $0xe8] sm:$0xff] %vm563_vm1, %v1448_v11  ;;  %v734_v28 = vsel %vm563_vm1, %v684_v19, 0.0  ;;  %v736_v30 = vsel %vm563_vm1, %v685_v21, 0.0 }
 0x10e   : > { %v624_v57 = vadd.f32 %v623_v53, %v622_v52  ;;  %v723_v58 = vadd.f32 %v722_v55, %v721_v51  ;;  %v686_v31 = vmul.f32 %v1376_v14, %v1376_v14  ;;  %v687_v35 = vmul.f32 %v1353_v1, %v1353_v1 }
 0x10f   : > { %v1465_v22 = vsel %vm563_vm1, %v696_v15, 0.0  ;;  %v639_v5 = vsel %vm563_vm1, %v1353_v1, 0.0  ;;  %v688_v40 = vmul.f32 %v1369_v10, %v1369_v10  ;;  %v689_v43 = vmul.f32 %v1396_v33, %v1396_v33 }
 0x110   : > { %v725_v63 = vadd.f32 %v724_v59, %v723_v58  ;;  %v626_v0 = vadd.f32 %v625_v60, %v624_v57  ;;  %v738_v42 = vsel %vm563_vm1, %v686_v31, 0.0  ;;  %v740_v48 = vsel %vm563_vm1, %v687_v35, 0.0 }
 0x111   : > { %v641_v14 = vsel %vm563_vm1, %v1369_v10, 0.0  ;;  %v643_v49 = vsel %vm563_vm1, %v1396_v33, 0.0  ;;  %v742_v52 = vsel %vm563_vm1, %v688_v40, 0.0  ;;  %v744_v53 = vsel %vm563_vm1, %v689_v43, 0.0 }
 0x112   : > { %v628_v7 = vadd.f32 %v627_v61, %v626_v0  ;;  %v727_v8 = vadd.f32 %v726_v3, %v725_v63  ;;  %v690_v54 = vmul.f32 %v1412_v44, %v1412_v44  ;;  %v691_v57 = vmul.f32 %v1389_v29, %v1389_v29 }
 0x113   : > { %v645_v10 = vsel %vm563_vm1, %v1412_v44, 0.0  ;;  %v647_v33 = vsel %vm563_vm1, %v1389_v29, 0.0  ;;  %v692_v60 = vmul.f32 %v1405_v39, %v1405_v39  ;;  %v693_v63 = vmul.f32 %v1434_v2, %v1434_v2 }
 0x114   : > { %v729_v17 = vadd.f32 %v728_v4, %v727_v8  ;;  %v630_v18 = vadd.f32 %v629_v13, %v628_v7  ;;  %v746_v61 = vsel %vm563_vm1, %v690_v54, 0.0  ;;  %v748_v4 = vsel %vm563_vm1, %v691_v57, 0.0 }
 0x115   : > { %v649_v44 = vsel %vm563_vm1, %v1405_v39, 0.0  ;;  %v651_v6 = vsel %vm563_vm1, %v1434_v2, 0.0  ;;  %v750_v7 = vsel %vm563_vm1, %v692_v60, 0.0  ;;  %v752_v8 = vsel %vm563_vm1, %v693_v63, 0.0 }
 0x116   : > { %v632_v50 = vadd.f32 %v631_v16, %v630_v18  ;;  %v731_v23 = vadd.f32 %v730_v20, %v729_v17  ;;  %v694_v12 = vmul.f32 %v1448_v11, %v1448_v11  ;;  %v695_v16 = vmul.f32 %v1429_v62, %v1429_v62 }
 0x117   : > { %v653_v39 = vsel %vm563_vm1, %v1448_v11, 0.0  ;;  %v655_v18 = vsel %vm563_vm1, %v1429_v62, 0.0 }
 0x118   : > { %v733_v26 = vadd.f32 %v732_v24, %v731_v23  ;;  %v634_v27 = vadd.f32 %v633_v37, %v632_v50  ;;  %v754_v19 = vsel %vm563_vm1, %v694_v12, 0.0  ;;  %v756_v50 = vsel %vm563_vm1, %v695_v16, 0.0 }
 0x11a   : > { %v636_v32 = vadd.f32 %v635_v25, %v634_v27  ;;  %v735_v34 = vadd.f32 %v734_v28, %v733_v26 }
 0x11c   : > { %v737_v36 = vadd.f32 %v736_v30, %v735_v34  ;;  %v638_v38 = vadd.f32 %v637_v46, %v636_v32 }
 0x11e   : > { %v640_v45 = vadd.f32 %v639_v5, %v638_v38  ;;  %v739_v47 = vadd.f32 %v738_v42, %v737_v36 }
 0x120   : > { %v741_v51 = vadd.f32 %v740_v48, %v739_v47  ;;  %v642_v1 = vadd.f32 %v641_v14, %v640_v45 }
 0x122   : > { %v644_v55 = vadd.f32 %v643_v49, %v642_v1  ;;  %v743_v56 = vadd.f32 %v742_v52, %v741_v51 }
 0x124   : > { %v745_v58 = vadd.f32 %v744_v53, %v743_v56  ;;  %v646_v59 = vadd.f32 %v645_v10, %v644_v55 }
 0x126   : > { %v648_v0 = vadd.f32 %v647_v33, %v646_v59  ;;  %v747_v3 = vadd.f32 %v746_v61, %v745_v58 }
 0x128   : > { %v749_v41 = vadd.f32 %v748_v4, %v747_v3  ;;  %v650_v29 = vadd.f32 %v649_v44, %v648_v0 }
 0x12a   : > { %v652_v13 = vadd.f32 %v651_v6, %v650_v29  ;;  %v751_v15 = vadd.f32 %v750_v7, %v749_v41 }
 0x12c   : > { %v753_v17 = vadd.f32 %v752_v8, %v751_v15  ;;  %v654_v2 = vadd.f32 %v653_v39, %v652_v13 }
 0x12e   : > { %v656_v20 = vadd.f32 %v655_v18, %v654_v2  ;;  %v755_v21 = vadd.f32 %v754_v19, %v753_v17 }
 0x130   : > { %v658_v23 = vadd.f32 %v1446_v9, %v656_v20  ;;  %v757_v24 = vadd.f32 %v756_v50, %v755_v21 }
 0x132   : > { %v659_v37 = vrot.slane %v658_v23, 4  ;;  %v759_v25 = vadd.f32 %v1465_v22, %v757_v24 }
 0x134   : > { %v660_v26 = vadd.f32 %v659_v37, %v658_v23  ;;  %v760_v11 = vrot.slane %v759_v25, 4 }
 0x136   : > { %v661_v27 = vrot.slane %v660_v26, 2  ;;  %v761_v28 = vadd.f32 %v760_v11, %v759_v25 }
 0x138   : > { %v662_v62 = vadd.f32 %v661_v27, %v660_v26  ;;  %v762_v30 = vrot.slane %v761_v28, 2 }
 0x13a   : > { %v663_v31 = vrot.slane %v662_v62, 1  ;;  %v763_v32 = vadd.f32 %v762_v30, %v761_v28 }
 0x13c   : > { %v764_v34 = vrot.slane %v763_v32, 1  ;;  %v664_v9 = vadd.f32 %v663_v31, %v662_v62 }
 0x13e   : > { %v765_v35 = vadd.f32 %v764_v34, %v763_v32 }
 0x140   : > { %v767_v22 = vsel %vm766_vm2, %v664_v9, %v765_v35 }
 0x141   : > { %769 = vst.msk [vmem:[%s204_s21] sm:$0x3] %vm768_vm3, %v767_v22 }
 0x142   : > { %1105 = shalt.err (!%p1102_p5)
}
 0x143   : > { %s1106_s28 = scalar_lea.hbm %s1531_s29, 32  ;;  %s1110_s10 = scalar_lea.hbm %s1581_s3, 64 }
 0x144   : > { %p1107_p6 = scmp.ne.s32.totalorder %s1531_s29, %s1106_s28  ;;  %p1111_p10 = scmp.lt.u32.totalorder %s1531_s29, %s1581_s3 }
 0x145   : > { %p1112_p11 = scmp.lt.u32.totalorder %s1110_s10, %s1106_s28  ;;  %p1114_p13 = scmp.lt.u32.totalorder %s1106_s28, %s1531_s29 }
 0x146   : > { %p1108_p7 = pnand %p1107_p6, %p1231_p4 }
 0x147   : > { %p1113_p12 = por %p1112_p11, %p1111_p10 }
 0x148   : > { %p1109_p9 = pneg %p1108_p7 }
 0x149   : > { %p1115_p0 = por %p1114_p13, %p1113_p12 }
 0x14b   : > { %p1116_p1 = pnand %p1115_p0, %p1109_p9 }
 0x14d   : > { %1119 = shalt.err (!%p1116_p1)
}
 0x14e   : > { %1019 = dma.vmem_to_hbm [thread:$0]  (%p1231_p4), %s1533_s23, 32, %s1531_s29, %s779_s30  }
 0x14f PF: > { %p1025_p2 = scmp.ge.s32.totalorder %s1170_s17, 2  ;;  %s820_s18 = sand.u32 1, %s1150_s12  }
 0x150   : > { %s821_s19 = scalar_lea.sflag [#allocation3], %s820_s18 }
 0x151   : > { %p1022_p3 = pnand %p1025_p2, %p1238_p8 }
 0x153   : > { %1145 = dma.done.wait (!%p1022_p3), %s821_s19, 32  }
 0x154   : > { %1147 = vsyncadd (!%p1022_p3), %s821_s19, 4294967264  ;;  %s17_s17 = sadd.s32 1, %s1170_s17   ;;  %s1584_s12 = smov %s1154_s13 }
 0x155   : > { %p14_p5 = scmp.ge.s32.totalorder %s17_s17, 4   ;;  %s1585_s13 = smov %s1158_s14 }
 0x156   : > { %s1586_s14 = smov %s1244_s25  ;;  %s1587_s15 = smov %s1166_s16 }
 0x157   : > { %s1588_s16 = smov %s1590_s20  ;;  %16 = sbr.rel (!%p14_p5) target bundleno = 4 (0x4), region = 78 }
 0x15e   :  { %826 = vsyncpa [#allocation3], 1 }
 0x15f   :  { %828 = vsyncpa [#allocation3 + $0x1], 1 }

</bundles_post_ra>
